<compile_context>
chip_gen: v6e
topology: v6e:2x2x1
jax: 0.10.0
libtpu: 0.0.40
codegen_flags: <defaults>
</compile_context>

<pallas_src>
import functools

import jax
import jax.numpy as jnp
from jax.experimental import pallas as pl
from jax.experimental.pallas import tpu as pltpu

EPS = 1e-5          # InstanceNorm2d default
NEG_SLOPE = 0.2     # LeakyReLU negative_slope

# Conv tap offset t in {0,1,2,3}  ->  (input parity plane, +/-1 shift in output coords).
# Padded coordinate 2*o + t corresponds to unpadded 2*(o + d) + parity.
_TAP = {0: (1, -1), 1: (0, 0), 2: (1, 0), 3: (0, 1)}


def _shift_lanes(x, k):
    """result[:, p] = x[:, (p + k) % P]; wrapped positions are masked by the caller."""
    k = k % x.shape[-1]
    if k == 0:
        return x
    return jnp.concatenate([x[:, k:], x[:, :k]], axis=-1)


def _ck_block_kernel(xq_ref, w_ref, o_ref, *, Ho, Wo):
    # xq_ref: (1, 2, 2, C_in, P) bf16  -- stride-2 parity planes, P = Ho*Wo flat on lanes
    # w_ref : (16, TCO, C_in)    bf16  -- per-tap weights, w_ref[t][co, ci]
    # o_ref : (1, TCO, P)        bf16
    P = Ho * Wo
    tco = w_ref.shape[1]

    # Boundary masks (True = valid); invalid lanes correspond to the conv's zero
    # padding and are zeroed before the matmul.  Row masks need no integer divide.
    q = jax.lax.broadcasted_iota(jnp.int32, (1, P), 1)
    wo = q % Wo
    col_ok = {-1: wo >= 1, 0: None, 1: wo < Wo - 1}
    row_ok = {-1: q >= Wo, 0: None, 1: q < (Ho - 1) * Wo}

    acc = jnp.zeros((tco, P), jnp.float32)
    for i in range(4):
        pi, dr = _TAP[i]
        rm = row_ok[dr]
        for j in range(4):
            pj, dc = _TAP[j]
            cm = col_ok[dc]
            slab = xq_ref[0, pi, pj]                         # (C_in, P) bf16
            slab = _shift_lanes(slab, dr * Wo + dc)          # shifted conv tap
            mask = rm if cm is None else (cm if rm is None else rm & cm)
            if mask is not None:
                slab = jnp.where(mask, slab, jnp.zeros_like(slab))
            acc = acc + jnp.dot(w_ref[i * 4 + j], slab,
                                preferred_element_type=jnp.float32)

    # InstanceNorm2d (affine=False): single-pass stats over the spatial (lane) axis.
    inv_p = 1.0 / P
    mean = jnp.sum(acc, axis=-1, keepdims=True) * inv_p
    ex2 = jnp.sum(acc * acc, axis=-1, keepdims=True) * inv_p
    var = jnp.maximum(ex2 - mean * mean, 0.0)
    y = (acc - mean) * jax.lax.rsqrt(var + EPS)

    # LeakyReLU(0.2) == max(y, 0.2*y) for a slope in (0, 1).
    y = jnp.maximum(y, NEG_SLOPE * y)
    o_ref[0] = y.astype(o_ref.dtype)


def c_k_block_forward(x, weight, bias=None, downsample=True, use_norm=True,
                      c_out_tile=None, out_dtype=jnp.bfloat16):
    """x: (B, C_in, H, W) NCHW. weight: (C_out, C_in, 4, 4). bias cancels under the norm."""
    if not use_norm:
        # TODO(synk): use_norm=False path (skip norm, re-add the conv bias).
        raise NotImplementedError("only the use_norm=True path is implemented")
    if not downsample:
        # TODO(synk): stride-1 path (the stride-2 parity decomposition does not apply).
        raise NotImplementedError("only the downsample=True path is implemented")

    B, C_in, H, W = x.shape
    C_out = weight.shape[0]
    assert weight.shape == (C_out, C_in, 4, 4)
    assert H % 2 == 0 and W % 2 == 0, "stride-2 parity split needs even spatial dims"
    Ho, Wo = H // 2, W // 2
    P = Ho * Wo
    del bias  # exactly cancelled by the InstanceNorm2d(affine=False) mean subtraction

    # Space-to-depth relayout (1x the input bytes, fused with the bf16 cast):
    #   xq[b, pi, pj, c, r*Wo + s] = x[b, c, 2r + pi, 2s + pj]
    xq = (x.reshape(B, C_in, Ho, 2, Wo, 2)
            .transpose(0, 3, 5, 1, 2, 4)
            .reshape(B, 2, 2, C_in, P)
            .astype(jnp.bfloat16))
    # Per-tap weights: wq[i*4 + j, co, ci] = weight[co, ci, i, j]
    wq = (weight.transpose(2, 3, 0, 1)
                .reshape(16, C_out, C_in)
                .astype(jnp.bfloat16))

    # Reduction-free C_out tiling (per-channel stats are independent across tiles).
    if c_out_tile is None:
        c_out_tile = C_out if C_out <= 256 else 256
    assert C_out % c_out_tile == 0 and (c_out_tile == C_out or c_out_tile % 8 == 0)
    n_co = C_out // c_out_tile

    # Explicit scoped-VMEM budget: double-buffered blocks + f32 accumulator + temps.
    blk_in = 2 * (4 * C_in * P * 2)              # (1,2,2,C_in,P) bf16, double-buffered
    blk_w = 2 * (16 * c_out_tile * C_in * 2)     # (16,TCO,C_in) bf16
    blk_out = 2 * (c_out_tile * P * 2)           # (1,TCO,P) bf16
    scratch = c_out_tile * P * 4 + 8 * C_in * P * 2
    vmem_bytes = int(min(2 * (blk_in + blk_w + blk_out + scratch) + (8 << 20),
                         100 << 20))

    kernel = functools.partial(_ck_block_kernel, Ho=Ho, Wo=Wo)
    out = pl.pallas_call(
        kernel,
        out_shape=jax.ShapeDtypeStruct((B, C_out, P), out_dtype),
        grid_spec=pltpu.PrefetchScalarGridSpec(
            num_scalar_prefetch=0,
            grid=(B, n_co),
            in_specs=[
                pl.BlockSpec((1, 2, 2, C_in, P), lambda b, co: (b, 0, 0, 0, 0)),
                pl.BlockSpec((16, c_out_tile, C_in), lambda b, co: (0, co, 0)),
            ],
            out_specs=pl.BlockSpec((1, c_out_tile, P), lambda b, co: (b, co, 0)),
        ),
        compiler_params=pltpu.CompilerParams(
            dimension_semantics=("parallel", "parallel"),  # batch + C_out tiles -> megacore
            vmem_limit_bytes=vmem_bytes,
        ),
    )(xq, wq)

    # (B, C_out, P) -> NCHW: pure reshape (P is already ho-major), no transpose.
    return out.reshape(B, C_out, Ho, Wo)


def _reference(x, weight, bias, downsample=True):
    """Pure-JAX f32 reference (conv -> instance norm -> leaky relu) for validation."""
    stride = 2 if downsample else 1
    y = jax.lax.conv_general_dilated(
        x, weight, window_strides=(stride, stride),
        padding=((1, 1), (1, 1)),
        dimension_numbers=("NCHW", "OIHW", "NCHW"),
    ) + bias.reshape(1, -1, 1, 1)
    mean = jnp.mean(y, axis=(2, 3), keepdims=True)
    var = jnp.mean((y - mean) ** 2, axis=(2, 3), keepdims=True)
    yn = (y - mean) / jnp.sqrt(var + EPS)
    return jnp.where(yn >= 0, yn, NEG_SLOPE * yn)


if __name__ == "__main__":
    B, C_in, C_out, H, W = 2, 4, 8, 16, 16

    key = jax.random.PRNGKey(0)
    kx, kw, kb = jax.random.split(key, 3)
    x = jax.random.normal(kx, (B, C_in, H, W), dtype=jnp.float32)
    # deterministic synthetic params (shapes per nn.Conv2d(C_in, C_out, (4,4)))
    weight = jax.random.normal(kw, (C_out, C_in, 4, 4), dtype=jnp.float32) * 0.1
    bias = jax.random.normal(kb, (C_out,), dtype=jnp.float32) * 0.1

    out = c_k_block_forward(x, weight, bias, downsample=True, use_norm=True)
    out = jax.block_until_ready(out)
    assert out.shape == (B, C_out, H // 2, W // 2), out.shape

    ref = jax.block_until_ready(_reference(x, weight, bias, downsample=True))
    # bf16 matmul operands AND bf16 output vs an all-f32 reference: allow small slack.
    err = float(jnp.max(jnp.abs(out.astype(jnp.float32) - ref)))
    assert err < 7.5e-2, err

    print("KERNEL_OK")
</pallas_src>

<mosaic_0001>
module attributes {stable_mosaic.version = 11 : i64} {
  func.func @_ck_block_kernel(%arg0: i32, %arg1: i32, %arg2: memref<1x2x2x4x64xbf16, #tpu.memory_space<vmem>>, %arg3: memref<16x8x4xbf16, #tpu.memory_space<vmem>>, %arg4: memref<1x8x64xbf16, #tpu.memory_space<vmem>>) attributes {dimension_semantics = [#tpu.dimension_semantics<parallel>, #tpu.dimension_semantics<parallel>], iteration_bounds = array<i64: 2, 1>, scalar_prefetch = 0 : i64, scratch_operands = 0 : i64, tpu.core_type = #tpu.core_type<tc>, window_params = [{transform_indices = @transform_0, window_bounds = array<i64: 1, 2, 2, 4, 64>}, {transform_indices = @transform_1, window_bounds = array<i64: 16, 8, 4>}, {transform_indices = @transform_2, window_bounds = array<i64: 1, 8, 64>}]} {
    %0 = tpu.iota {dimensions = array<i32: 1>} : vector<1x64xi32>
    %c8_i32 = arith.constant 8 : i32
    %c0_i32 = arith.constant 0 : i32
    %1 = arith.cmpi eq, %c8_i32, %c0_i32 : i32
    %c1_i32 = arith.constant 1 : i32
    %2 = arith.select %1, %c1_i32, %c8_i32 : i32
    %3 = vector.broadcast %2 : i32 to vector<1x64xi32>
    %4 = arith.remsi %0, %3 : vector<1x64xi32>
    %c0_i32_0 = arith.constant 0 : i32
    %5 = vector.broadcast %c0_i32_0 : i32 to vector<1x64xi32>
    %6 = arith.cmpi ne, %4, %5 : vector<1x64xi32>
    %c0_i32_1 = arith.constant 0 : i32
    %7 = vector.broadcast %c0_i32_1 : i32 to vector<1x64xi32>
    %8 = arith.cmpi slt, %4, %7 : vector<1x64xi32>
    %c0_i32_2 = arith.constant 0 : i32
    %9 = arith.cmpi slt, %2, %c0_i32_2 : i32
    %10 = vector.broadcast %9 : i1 to vector<1x64xi1>
    %11 = vector.broadcast %10 : vector<1x64xi1> to vector<1x64xi1>
    %12 = arith.xori %8, %11 : vector<1x64xi1>
    %13 = arith.andi %12, %6 : vector<1x64xi1>
    %14 = vector.broadcast %2 : i32 to vector<1x64xi32>
    %15 = arith.addi %4, %14 : vector<1x64xi32>
    %16 = arith.select %13, %15, %4 : vector<1x64xi1>, vector<1x64xi32>
    %c1_i32_3 = arith.constant 1 : i32
    %17 = vector.broadcast %c1_i32_3 : i32 to vector<1x64xi32>
    %18 = arith.cmpi sge, %16, %17 : vector<1x64xi32>
    %c7_i32 = arith.constant 7 : i32
    %19 = vector.broadcast %c7_i32 : i32 to vector<1x64xi32>
    %20 = arith.cmpi slt, %16, %19 : vector<1x64xi32>
    %c8_i32_4 = arith.constant 8 : i32
    %21 = vector.broadcast %c8_i32_4 : i32 to vector<1x64xi32>
    %22 = arith.cmpi sge, %0, %21 : vector<1x64xi32>
    %c56_i32 = arith.constant 56 : i32
    %23 = vector.broadcast %c56_i32 : i32 to vector<1x64xi32>
    %24 = arith.cmpi slt, %0, %23 : vector<1x64xi32>
    %cst = arith.constant 0.000000e+00 : f32
    %25 = vector.broadcast %cst : f32 to vector<8x64xf32>
    %c0 = arith.constant 0 : index
    %c1 = arith.constant 1 : index
    %c1_5 = arith.constant 1 : index
    %c0_6 = arith.constant 0 : index
    %c0_7 = arith.constant 0 : index
    %26 = vector.load %arg2[%c0, %c1, %c1_5, %c0_6, %c0_7] : memref<1x2x2x4x64xbf16, #tpu.memory_space<vmem>>, vector<1x1x1x4x64xbf16>
    %27 = vector.shape_cast %26 : vector<1x1x1x4x64xbf16> to vector<4x64xbf16>
    %28 = vector.extract_strided_slice %27 {offsets = [0, 55], sizes = [4, 9], strides = [1, 1]} : vector<4x64xbf16> to vector<4x9xbf16>
    %29 = vector.extract_strided_slice %27 {offsets = [0, 0], sizes = [4, 55], strides = [1, 1]} : vector<4x64xbf16> to vector<4x55xbf16>
    %30 = tpu.concatenate %28, %29 in 1 : vector<4x9xbf16>, vector<4x55xbf16> -> vector<4x64xbf16>
    %31 = arith.andi %22, %18 : vector<1x64xi1>
    %cst_8 = arith.constant 0.000000e+00 : bf16
    %32 = vector.broadcast %cst_8 : bf16 to vector<4x64xbf16>
    %33 = vector.shape_cast %31 : vector<1x64xi1> to vector<1x64xi1>
    %34 = vector.broadcast %33 : vector<1x64xi1> to vector<4x64xi1>
    %35 = arith.select %34, %30, %32 : vector<4x64xi1>, vector<4x64xbf16>
    %c0_9 = arith.constant 0 : index
    %c0_10 = arith.constant 0 : index
    %c0_11 = arith.constant 0 : index
    %36 = vector.load %arg3[%c0_9, %c0_10, %c0_11] : memref<16x8x4xbf16, #tpu.memory_space<vmem>>, vector<1x8x4xbf16>
    %37 = vector.shape_cast %36 : vector<1x8x4xbf16> to vector<8x4xbf16>
    %cst_12 = arith.constant dense<0.000000e+00> : vector<8x64xf32>
    %38 = tpu.matmul %37, %35, %cst_12 {dimension_numbers = #tpu.dot_dimension_numbers<[1], [0], [0], [1], [0, 0, 1, 1], [], []>} : vector<8x4xbf16>, vector<4x64xbf16>, vector<8x64xf32> -> vector<8x64xf32>
    %39 = arith.addf %25, %38 : vector<8x64xf32>
    %c0_13 = arith.constant 0 : index
    %c1_14 = arith.constant 1 : index
    %c0_15 = arith.constant 0 : index
    %c0_16 = arith.constant 0 : index
    %c0_17 = arith.constant 0 : index
    %40 = vector.load %arg2[%c0_13, %c1_14, %c0_15, %c0_16, %c0_17] : memref<1x2x2x4x64xbf16, #tpu.memory_space<vmem>>, vector<1x1x1x4x64xbf16>
    %41 = vector.shape_cast %40 : vector<1x1x1x4x64xbf16> to vector<4x64xbf16>
    %42 = vector.extract_strided_slice %41 {offsets = [0, 56], sizes = [4, 8], strides = [1, 1]} : vector<4x64xbf16> to vector<4x8xbf16>
    %43 = vector.extract_strided_slice %41 {offsets = [0, 0], sizes = [4, 56], strides = [1, 1]} : vector<4x64xbf16> to vector<4x56xbf16>
    %44 = tpu.concatenate %42, %43 in 1 : vector<4x8xbf16>, vector<4x56xbf16> -> vector<4x64xbf16>
    %cst_18 = arith.constant 0.000000e+00 : bf16
    %45 = vector.broadcast %cst_18 : bf16 to vector<4x64xbf16>
    %46 = vector.shape_cast %22 : vector<1x64xi1> to vector<1x64xi1>
    %47 = vector.broadcast %46 : vector<1x64xi1> to vector<4x64xi1>
    %48 = arith.select %47, %44, %45 : vector<4x64xi1>, vector<4x64xbf16>
    %c1_19 = arith.constant 1 : index
    %c0_20 = arith.constant 0 : index
    %c0_21 = arith.constant 0 : index
    %49 = vector.load %arg3[%c1_19, %c0_20, %c0_21] : memref<16x8x4xbf16, #tpu.memory_space<vmem>>, vector<1x8x4xbf16>
    %50 = vector.shape_cast %49 : vector<1x8x4xbf16> to vector<8x4xbf16>
    %cst_22 = arith.constant dense<0.000000e+00> : vector<8x64xf32>
    %51 = tpu.matmul %50, %48, %cst_22 {dimension_numbers = #tpu.dot_dimension_numbers<[1], [0], [0], [1], [0, 0, 1, 1], [], []>} : vector<8x4xbf16>, vector<4x64xbf16>, vector<8x64xf32> -> vector<8x64xf32>
    %52 = arith.addf %39, %51 : vector<8x64xf32>
    %c0_23 = arith.constant 0 : index
    %c1_24 = arith.constant 1 : index
    %c1_25 = arith.constant 1 : index
    %c0_26 = arith.constant 0 : index
    %c0_27 = arith.constant 0 : index
    %53 = vector.load %arg2[%c0_23, %c1_24, %c1_25, %c0_26, %c0_27] : memref<1x2x2x4x64xbf16, #tpu.memory_space<vmem>>, vector<1x1x1x4x64xbf16>
    %54 = vector.shape_cast %53 : vector<1x1x1x4x64xbf16> to vector<4x64xbf16>
    %55 = vector.extract_strided_slice %54 {offsets = [0, 56], sizes = [4, 8], strides = [1, 1]} : vector<4x64xbf16> to vector<4x8xbf16>
    %56 = vector.extract_strided_slice %54 {offsets = [0, 0], sizes = [4, 56], strides = [1, 1]} : vector<4x64xbf16> to vector<4x56xbf16>
    %57 = tpu.concatenate %55, %56 in 1 : vector<4x8xbf16>, vector<4x56xbf16> -> vector<4x64xbf16>
    %cst_28 = arith.constant 0.000000e+00 : bf16
    %58 = vector.broadcast %cst_28 : bf16 to vector<4x64xbf16>
    %59 = vector.shape_cast %22 : vector<1x64xi1> to vector<1x64xi1>
    %60 = vector.broadcast %59 : vector<1x64xi1> to vector<4x64xi1>
    %61 = arith.select %60, %57, %58 : vector<4x64xi1>, vector<4x64xbf16>
    %c2 = arith.constant 2 : index
    %c0_29 = arith.constant 0 : index
    %c0_30 = arith.constant 0 : index
    %62 = vector.load %arg3[%c2, %c0_29, %c0_30] : memref<16x8x4xbf16, #tpu.memory_space<vmem>>, vector<1x8x4xbf16>
    %63 = vector.shape_cast %62 : vector<1x8x4xbf16> to vector<8x4xbf16>
    %cst_31 = arith.constant dense<0.000000e+00> : vector<8x64xf32>
    %64 = tpu.matmul %63, %61, %cst_31 {dimension_numbers = #tpu.dot_dimension_numbers<[1], [0], [0], [1], [0, 0, 1, 1], [], []>} : vector<8x4xbf16>, vector<4x64xbf16>, vector<8x64xf32> -> vector<8x64xf32>
    %65 = arith.addf %52, %64 : vector<8x64xf32>
    %c0_32 = arith.constant 0 : index
    %c1_33 = arith.constant 1 : index
    %c0_34 = arith.constant 0 : index
    %c0_35 = arith.constant 0 : index
    %c0_36 = arith.constant 0 : index
    %66 = vector.load %arg2[%c0_32, %c1_33, %c0_34, %c0_35, %c0_36] : memref<1x2x2x4x64xbf16, #tpu.memory_space<vmem>>, vector<1x1x1x4x64xbf16>
    %67 = vector.shape_cast %66 : vector<1x1x1x4x64xbf16> to vector<4x64xbf16>
    %68 = vector.extract_strided_slice %67 {offsets = [0, 57], sizes = [4, 7], strides = [1, 1]} : vector<4x64xbf16> to vector<4x7xbf16>
    %69 = vector.extract_strided_slice %67 {offsets = [0, 0], sizes = [4, 57], strides = [1, 1]} : vector<4x64xbf16> to vector<4x57xbf16>
    %70 = tpu.concatenate %68, %69 in 1 : vector<4x7xbf16>, vector<4x57xbf16> -> vector<4x64xbf16>
    %71 = arith.andi %22, %20 : vector<1x64xi1>
    %cst_37 = arith.constant 0.000000e+00 : bf16
    %72 = vector.broadcast %cst_37 : bf16 to vector<4x64xbf16>
    %73 = vector.shape_cast %71 : vector<1x64xi1> to vector<1x64xi1>
    %74 = vector.broadcast %73 : vector<1x64xi1> to vector<4x64xi1>
    %75 = arith.select %74, %70, %72 : vector<4x64xi1>, vector<4x64xbf16>
    %c3 = arith.constant 3 : index
    %c0_38 = arith.constant 0 : index
    %c0_39 = arith.constant 0 : index
    %76 = vector.load %arg3[%c3, %c0_38, %c0_39] : memref<16x8x4xbf16, #tpu.memory_space<vmem>>, vector<1x8x4xbf16>
    %77 = vector.shape_cast %76 : vector<1x8x4xbf16> to vector<8x4xbf16>
    %cst_40 = arith.constant dense<0.000000e+00> : vector<8x64xf32>
    %78 = tpu.matmul %77, %75, %cst_40 {dimension_numbers = #tpu.dot_dimension_numbers<[1], [0], [0], [1], [0, 0, 1, 1], [], []>} : vector<8x4xbf16>, vector<4x64xbf16>, vector<8x64xf32> -> vector<8x64xf32>
    %79 = arith.addf %65, %78 : vector<8x64xf32>
    %c0_41 = arith.constant 0 : index
    %c0_42 = arith.constant 0 : index
    %c1_43 = arith.constant 1 : index
    %c0_44 = arith.constant 0 : index
    %c0_45 = arith.constant 0 : index
    %80 = vector.load %arg2[%c0_41, %c0_42, %c1_43, %c0_44, %c0_45] : memref<1x2x2x4x64xbf16, #tpu.memory_space<vmem>>, vector<1x1x1x4x64xbf16>
    %81 = vector.shape_cast %80 : vector<1x1x1x4x64xbf16> to vector<4x64xbf16>
    %82 = vector.extract_strided_slice %81 {offsets = [0, 63], sizes = [4, 1], strides = [1, 1]} : vector<4x64xbf16> to vector<4x1xbf16>
    %83 = vector.extract_strided_slice %81 {offsets = [0, 0], sizes = [4, 63], strides = [1, 1]} : vector<4x64xbf16> to vector<4x63xbf16>
    %84 = tpu.concatenate %82, %83 in 1 : vector<4x1xbf16>, vector<4x63xbf16> -> vector<4x64xbf16>
    %cst_46 = arith.constant 0.000000e+00 : bf16
    %85 = vector.broadcast %cst_46 : bf16 to vector<4x64xbf16>
    %86 = vector.shape_cast %18 : vector<1x64xi1> to vector<1x64xi1>
    %87 = vector.broadcast %86 : vector<1x64xi1> to vector<4x64xi1>
    %88 = arith.select %87, %84, %85 : vector<4x64xi1>, vector<4x64xbf16>
    %c4 = arith.constant 4 : index
    %c0_47 = arith.constant 0 : index
    %c0_48 = arith.constant 0 : index
    %89 = vector.load %arg3[%c4, %c0_47, %c0_48] : memref<16x8x4xbf16, #tpu.memory_space<vmem>>, vector<1x8x4xbf16>
    %90 = vector.shape_cast %89 : vector<1x8x4xbf16> to vector<8x4xbf16>
    %cst_49 = arith.constant dense<0.000000e+00> : vector<8x64xf32>
    %91 = tpu.matmul %90, %88, %cst_49 {dimension_numbers = #tpu.dot_dimension_numbers<[1], [0], [0], [1], [0, 0, 1, 1], [], []>} : vector<8x4xbf16>, vector<4x64xbf16>, vector<8x64xf32> -> vector<8x64xf32>
    %92 = arith.addf %79, %91 : vector<8x64xf32>
    %c0_50 = arith.constant 0 : index
    %c0_51 = arith.constant 0 : index
    %c0_52 = arith.constant 0 : index
    %c0_53 = arith.constant 0 : index
    %c0_54 = arith.constant 0 : index
    %93 = vector.load %arg2[%c0_50, %c0_51, %c0_52, %c0_53, %c0_54] : memref<1x2x2x4x64xbf16, #tpu.memory_space<vmem>>, vector<1x1x1x4x64xbf16>
    %94 = vector.shape_cast %93 : vector<1x1x1x4x64xbf16> to vector<4x64xbf16>
    %c5 = arith.constant 5 : index
    %c0_55 = arith.constant 0 : index
    %c0_56 = arith.constant 0 : index
    %95 = vector.load %arg3[%c5, %c0_55, %c0_56] : memref<16x8x4xbf16, #tpu.memory_space<vmem>>, vector<1x8x4xbf16>
    %96 = vector.shape_cast %95 : vector<1x8x4xbf16> to vector<8x4xbf16>
    %cst_57 = arith.constant dense<0.000000e+00> : vector<8x64xf32>
    %97 = tpu.matmul %96, %94, %cst_57 {dimension_numbers = #tpu.dot_dimension_numbers<[1], [0], [0], [1], [0, 0, 1, 1], [], []>} : vector<8x4xbf16>, vector<4x64xbf16>, vector<8x64xf32> -> vector<8x64xf32>
    %98 = arith.addf %92, %97 : vector<8x64xf32>
    %c0_58 = arith.constant 0 : index
    %c0_59 = arith.constant 0 : index
    %c1_60 = arith.constant 1 : index
    %c0_61 = arith.constant 0 : index
    %c0_62 = arith.constant 0 : index
    %99 = vector.load %arg2[%c0_58, %c0_59, %c1_60, %c0_61, %c0_62] : memref<1x2x2x4x64xbf16, #tpu.memory_space<vmem>>, vector<1x1x1x4x64xbf16>
    %100 = vector.shape_cast %99 : vector<1x1x1x4x64xbf16> to vector<4x64xbf16>
    %c6 = arith.constant 6 : index
    %c0_63 = arith.constant 0 : index
    %c0_64 = arith.constant 0 : index
    %101 = vector.load %arg3[%c6, %c0_63, %c0_64] : memref<16x8x4xbf16, #tpu.memory_space<vmem>>, vector<1x8x4xbf16>
    %102 = vector.shape_cast %101 : vector<1x8x4xbf16> to vector<8x4xbf16>
    %cst_65 = arith.constant dense<0.000000e+00> : vector<8x64xf32>
    %103 = tpu.matmul %102, %100, %cst_65 {dimension_numbers = #tpu.dot_dimension_numbers<[1], [0], [0], [1], [0, 0, 1, 1], [], []>} : vector<8x4xbf16>, vector<4x64xbf16>, vector<8x64xf32> -> vector<8x64xf32>
    %104 = arith.addf %98, %103 : vector<8x64xf32>
    %c0_66 = arith.constant 0 : index
    %c0_67 = arith.constant 0 : index
    %c0_68 = arith.constant 0 : index
    %c0_69 = arith.constant 0 : index
    %c0_70 = arith.constant 0 : index
    %105 = vector.load %arg2[%c0_66, %c0_67, %c0_68, %c0_69, %c0_70] : memref<1x2x2x4x64xbf16, #tpu.memory_space<vmem>>, vector<1x1x1x4x64xbf16>
    %106 = vector.shape_cast %105 : vector<1x1x1x4x64xbf16> to vector<4x64xbf16>
    %107 = vector.extract_strided_slice %106 {offsets = [0, 1], sizes = [4, 63], strides = [1, 1]} : vector<4x64xbf16> to vector<4x63xbf16>
    %108 = vector.extract_strided_slice %106 {offsets = [0, 0], sizes = [4, 1], strides = [1, 1]} : vector<4x64xbf16> to vector<4x1xbf16>
    %109 = tpu.concatenate %107, %108 in 1 : vector<4x63xbf16>, vector<4x1xbf16> -> vector<4x64xbf16>
    %cst_71 = arith.constant 0.000000e+00 : bf16
    %110 = vector.broadcast %cst_71 : bf16 to vector<4x64xbf16>
    %111 = vector.shape_cast %20 : vector<1x64xi1> to vector<1x64xi1>
    %112 = vector.broadcast %111 : vector<1x64xi1> to vector<4x64xi1>
    %113 = arith.select %112, %109, %110 : vector<4x64xi1>, vector<4x64xbf16>
    %c7 = arith.constant 7 : index
    %c0_72 = arith.constant 0 : index
    %c0_73 = arith.constant 0 : index
    %114 = vector.load %arg3[%c7, %c0_72, %c0_73] : memref<16x8x4xbf16, #tpu.memory_space<vmem>>, vector<1x8x4xbf16>
    %115 = vector.shape_cast %114 : vector<1x8x4xbf16> to vector<8x4xbf16>
    %cst_74 = arith.constant dense<0.000000e+00> : vector<8x64xf32>
    %116 = tpu.matmul %115, %113, %cst_74 {dimension_numbers = #tpu.dot_dimension_numbers<[1], [0], [0], [1], [0, 0, 1, 1], [], []>} : vector<8x4xbf16>, vector<4x64xbf16>, vector<8x64xf32> -> vector<8x64xf32>
    %117 = arith.addf %104, %116 : vector<8x64xf32>
    %c0_75 = arith.constant 0 : index
    %c1_76 = arith.constant 1 : index
    %c1_77 = arith.constant 1 : index
    %c0_78 = arith.constant 0 : index
    %c0_79 = arith.constant 0 : index
    %118 = vector.load %arg2[%c0_75, %c1_76, %c1_77, %c0_78, %c0_79] : memref<1x2x2x4x64xbf16, #tpu.memory_space<vmem>>, vector<1x1x1x4x64xbf16>
    %119 = vector.shape_cast %118 : vector<1x1x1x4x64xbf16> to vector<4x64xbf16>
    %120 = vector.extract_strided_slice %119 {offsets = [0, 63], sizes = [4, 1], strides = [1, 1]} : vector<4x64xbf16> to vector<4x1xbf16>
    %121 = vector.extract_strided_slice %119 {offsets = [0, 0], sizes = [4, 63], strides = [1, 1]} : vector<4x64xbf16> to vector<4x63xbf16>
    %122 = tpu.concatenate %120, %121 in 1 : vector<4x1xbf16>, vector<4x63xbf16> -> vector<4x64xbf16>
    %cst_80 = arith.constant 0.000000e+00 : bf16
    %123 = vector.broadcast %cst_80 : bf16 to vector<4x64xbf16>
    %124 = vector.shape_cast %18 : vector<1x64xi1> to vector<1x64xi1>
    %125 = vector.broadcast %124 : vector<1x64xi1> to vector<4x64xi1>
    %126 = arith.select %125, %122, %123 : vector<4x64xi1>, vector<4x64xbf16>
    %c8 = arith.constant 8 : index
    %c0_81 = arith.constant 0 : index
    %c0_82 = arith.constant 0 : index
    %127 = vector.load %arg3[%c8, %c0_81, %c0_82] : memref<16x8x4xbf16, #tpu.memory_space<vmem>>, vector<1x8x4xbf16>
    %128 = vector.shape_cast %127 : vector<1x8x4xbf16> to vector<8x4xbf16>
    %cst_83 = arith.constant dense<0.000000e+00> : vector<8x64xf32>
    %129 = tpu.matmul %128, %126, %cst_83 {dimension_numbers = #tpu.dot_dimension_numbers<[1], [0], [0], [1], [0, 0, 1, 1], [], []>} : vector<8x4xbf16>, vector<4x64xbf16>, vector<8x64xf32> -> vector<8x64xf32>
    %130 = arith.addf %117, %129 : vector<8x64xf32>
    %c0_84 = arith.constant 0 : index
    %c1_85 = arith.constant 1 : index
    %c0_86 = arith.constant 0 : index
    %c0_87 = arith.constant 0 : index
    %c0_88 = arith.constant 0 : index
    %131 = vector.load %arg2[%c0_84, %c1_85, %c0_86, %c0_87, %c0_88] : memref<1x2x2x4x64xbf16, #tpu.memory_space<vmem>>, vector<1x1x1x4x64xbf16>
    %132 = vector.shape_cast %131 : vector<1x1x1x4x64xbf16> to vector<4x64xbf16>
    %c9 = arith.constant 9 : index
    %c0_89 = arith.constant 0 : index
    %c0_90 = arith.constant 0 : index
    %133 = vector.load %arg3[%c9, %c0_89, %c0_90] : memref<16x8x4xbf16, #tpu.memory_space<vmem>>, vector<1x8x4xbf16>
    %134 = vector.shape_cast %133 : vector<1x8x4xbf16> to vector<8x4xbf16>
    %cst_91 = arith.constant dense<0.000000e+00> : vector<8x64xf32>
    %135 = tpu.matmul %134, %132, %cst_91 {dimension_numbers = #tpu.dot_dimension_numbers<[1], [0], [0], [1], [0, 0, 1, 1], [], []>} : vector<8x4xbf16>, vector<4x64xbf16>, vector<8x64xf32> -> vector<8x64xf32>
    %136 = arith.addf %130, %135 : vector<8x64xf32>
    %c0_92 = arith.constant 0 : index
    %c1_93 = arith.constant 1 : index
    %c1_94 = arith.constant 1 : index
    %c0_95 = arith.constant 0 : index
    %c0_96 = arith.constant 0 : index
    %137 = vector.load %arg2[%c0_92, %c1_93, %c1_94, %c0_95, %c0_96] : memref<1x2x2x4x64xbf16, #tpu.memory_space<vmem>>, vector<1x1x1x4x64xbf16>
    %138 = vector.shape_cast %137 : vector<1x1x1x4x64xbf16> to vector<4x64xbf16>
    %c10 = arith.constant 10 : index
    %c0_97 = arith.constant 0 : index
    %c0_98 = arith.constant 0 : index
    %139 = vector.load %arg3[%c10, %c0_97, %c0_98] : memref<16x8x4xbf16, #tpu.memory_space<vmem>>, vector<1x8x4xbf16>
    %140 = vector.shape_cast %139 : vector<1x8x4xbf16> to vector<8x4xbf16>
    %cst_99 = arith.constant dense<0.000000e+00> : vector<8x64xf32>
    %141 = tpu.matmul %140, %138, %cst_99 {dimension_numbers = #tpu.dot_dimension_numbers<[1], [0], [0], [1], [0, 0, 1, 1], [], []>} : vector<8x4xbf16>, vector<4x64xbf16>, vector<8x64xf32> -> vector<8x64xf32>
    %142 = arith.addf %136, %141 : vector<8x64xf32>
    %c0_100 = arith.constant 0 : index
    %c1_101 = arith.constant 1 : index
    %c0_102 = arith.constant 0 : index
    %c0_103 = arith.constant 0 : index
    %c0_104 = arith.constant 0 : index
    %143 = vector.load %arg2[%c0_100, %c1_101, %c0_102, %c0_103, %c0_104] : memref<1x2x2x4x64xbf16, #tpu.memory_space<vmem>>, vector<1x1x1x4x64xbf16>
    %144 = vector.shape_cast %143 : vector<1x1x1x4x64xbf16> to vector<4x64xbf16>
    %145 = vector.extract_strided_slice %144 {offsets = [0, 1], sizes = [4, 63], strides = [1, 1]} : vector<4x64xbf16> to vector<4x63xbf16>
    %146 = vector.extract_strided_slice %144 {offsets = [0, 0], sizes = [4, 1], strides = [1, 1]} : vector<4x64xbf16> to vector<4x1xbf16>
    %147 = tpu.concatenate %145, %146 in 1 : vector<4x63xbf16>, vector<4x1xbf16> -> vector<4x64xbf16>
    %cst_105 = arith.constant 0.000000e+00 : bf16
    %148 = vector.broadcast %cst_105 : bf16 to vector<4x64xbf16>
    %149 = vector.shape_cast %20 : vector<1x64xi1> to vector<1x64xi1>
    %150 = vector.broadcast %149 : vector<1x64xi1> to vector<4x64xi1>
    %151 = arith.select %150, %147, %148 : vector<4x64xi1>, vector<4x64xbf16>
    %c11 = arith.constant 11 : index
    %c0_106 = arith.constant 0 : index
    %c0_107 = arith.constant 0 : index
    %152 = vector.load %arg3[%c11, %c0_106, %c0_107] : memref<16x8x4xbf16, #tpu.memory_space<vmem>>, vector<1x8x4xbf16>
    %153 = vector.shape_cast %152 : vector<1x8x4xbf16> to vector<8x4xbf16>
    %cst_108 = arith.constant dense<0.000000e+00> : vector<8x64xf32>
    %154 = tpu.matmul %153, %151, %cst_108 {dimension_numbers = #tpu.dot_dimension_numbers<[1], [0], [0], [1], [0, 0, 1, 1], [], []>} : vector<8x4xbf16>, vector<4x64xbf16>, vector<8x64xf32> -> vector<8x64xf32>
    %155 = arith.addf %142, %154 : vector<8x64xf32>
    %c0_109 = arith.constant 0 : index
    %c0_110 = arith.constant 0 : index
    %c1_111 = arith.constant 1 : index
    %c0_112 = arith.constant 0 : index
    %c0_113 = arith.constant 0 : index
    %156 = vector.load %arg2[%c0_109, %c0_110, %c1_111, %c0_112, %c0_113] : memref<1x2x2x4x64xbf16, #tpu.memory_space<vmem>>, vector<1x1x1x4x64xbf16>
    %157 = vector.shape_cast %156 : vector<1x1x1x4x64xbf16> to vector<4x64xbf16>
    %158 = vector.extract_strided_slice %157 {offsets = [0, 7], sizes = [4, 57], strides = [1, 1]} : vector<4x64xbf16> to vector<4x57xbf16>
    %159 = vector.extract_strided_slice %157 {offsets = [0, 0], sizes = [4, 7], strides = [1, 1]} : vector<4x64xbf16> to vector<4x7xbf16>
    %160 = tpu.concatenate %158, %159 in 1 : vector<4x57xbf16>, vector<4x7xbf16> -> vector<4x64xbf16>
    %161 = arith.andi %24, %18 : vector<1x64xi1>
    %cst_114 = arith.constant 0.000000e+00 : bf16
    %162 = vector.broadcast %cst_114 : bf16 to vector<4x64xbf16>
    %163 = vector.shape_cast %161 : vector<1x64xi1> to vector<1x64xi1>
    %164 = vector.broadcast %163 : vector<1x64xi1> to vector<4x64xi1>
    %165 = arith.select %164, %160, %162 : vector<4x64xi1>, vector<4x64xbf16>
    %c12 = arith.constant 12 : index
    %c0_115 = arith.constant 0 : index
    %c0_116 = arith.constant 0 : index
    %166 = vector.load %arg3[%c12, %c0_115, %c0_116] : memref<16x8x4xbf16, #tpu.memory_space<vmem>>, vector<1x8x4xbf16>
    %167 = vector.shape_cast %166 : vector<1x8x4xbf16> to vector<8x4xbf16>
    %cst_117 = arith.constant dense<0.000000e+00> : vector<8x64xf32>
    %168 = tpu.matmul %167, %165, %cst_117 {dimension_numbers = #tpu.dot_dimension_numbers<[1], [0], [0], [1], [0, 0, 1, 1], [], []>} : vector<8x4xbf16>, vector<4x64xbf16>, vector<8x64xf32> -> vector<8x64xf32>
    %169 = arith.addf %155, %168 : vector<8x64xf32>
    %c0_118 = arith.constant 0 : index
    %c0_119 = arith.constant 0 : index
    %c0_120 = arith.constant 0 : index
    %c0_121 = arith.constant 0 : index
    %c0_122 = arith.constant 0 : index
    %170 = vector.load %arg2[%c0_118, %c0_119, %c0_120, %c0_121, %c0_122] : memref<1x2x2x4x64xbf16, #tpu.memory_space<vmem>>, vector<1x1x1x4x64xbf16>
    %171 = vector.shape_cast %170 : vector<1x1x1x4x64xbf16> to vector<4x64xbf16>
    %172 = vector.extract_strided_slice %171 {offsets = [0, 8], sizes = [4, 56], strides = [1, 1]} : vector<4x64xbf16> to vector<4x56xbf16>
    %173 = vector.extract_strided_slice %171 {offsets = [0, 0], sizes = [4, 8], strides = [1, 1]} : vector<4x64xbf16> to vector<4x8xbf16>
    %174 = tpu.concatenate %172, %173 in 1 : vector<4x56xbf16>, vector<4x8xbf16> -> vector<4x64xbf16>
    %cst_123 = arith.constant 0.000000e+00 : bf16
    %175 = vector.broadcast %cst_123 : bf16 to vector<4x64xbf16>
    %176 = vector.shape_cast %24 : vector<1x64xi1> to vector<1x64xi1>
    %177 = vector.broadcast %176 : vector<1x64xi1> to vector<4x64xi1>
    %178 = arith.select %177, %174, %175 : vector<4x64xi1>, vector<4x64xbf16>
    %c13 = arith.constant 13 : index
    %c0_124 = arith.constant 0 : index
    %c0_125 = arith.constant 0 : index
    %179 = vector.load %arg3[%c13, %c0_124, %c0_125] : memref<16x8x4xbf16, #tpu.memory_space<vmem>>, vector<1x8x4xbf16>
    %180 = vector.shape_cast %179 : vector<1x8x4xbf16> to vector<8x4xbf16>
    %cst_126 = arith.constant dense<0.000000e+00> : vector<8x64xf32>
    %181 = tpu.matmul %180, %178, %cst_126 {dimension_numbers = #tpu.dot_dimension_numbers<[1], [0], [0], [1], [0, 0, 1, 1], [], []>} : vector<8x4xbf16>, vector<4x64xbf16>, vector<8x64xf32> -> vector<8x64xf32>
    %182 = arith.addf %169, %181 : vector<8x64xf32>
    %c0_127 = arith.constant 0 : index
    %c0_128 = arith.constant 0 : index
    %c1_129 = arith.constant 1 : index
    %c0_130 = arith.constant 0 : index
    %c0_131 = arith.constant 0 : index
    %183 = vector.load %arg2[%c0_127, %c0_128, %c1_129, %c0_130, %c0_131] : memref<1x2x2x4x64xbf16, #tpu.memory_space<vmem>>, vector<1x1x1x4x64xbf16>
    %184 = vector.shape_cast %183 : vector<1x1x1x4x64xbf16> to vector<4x64xbf16>
    %185 = vector.extract_strided_slice %184 {offsets = [0, 8], sizes = [4, 56], strides = [1, 1]} : vector<4x64xbf16> to vector<4x56xbf16>
    %186 = vector.extract_strided_slice %184 {offsets = [0, 0], sizes = [4, 8], strides = [1, 1]} : vector<4x64xbf16> to vector<4x8xbf16>
    %187 = tpu.concatenate %185, %186 in 1 : vector<4x56xbf16>, vector<4x8xbf16> -> vector<4x64xbf16>
    %cst_132 = arith.constant 0.000000e+00 : bf16
    %188 = vector.broadcast %cst_132 : bf16 to vector<4x64xbf16>
    %189 = vector.shape_cast %24 : vector<1x64xi1> to vector<1x64xi1>
    %190 = vector.broadcast %189 : vector<1x64xi1> to vector<4x64xi1>
    %191 = arith.select %190, %187, %188 : vector<4x64xi1>, vector<4x64xbf16>
    %c14 = arith.constant 14 : index
    %c0_133 = arith.constant 0 : index
    %c0_134 = arith.constant 0 : index
    %192 = vector.load %arg3[%c14, %c0_133, %c0_134] : memref<16x8x4xbf16, #tpu.memory_space<vmem>>, vector<1x8x4xbf16>
    %193 = vector.shape_cast %192 : vector<1x8x4xbf16> to vector<8x4xbf16>
    %cst_135 = arith.constant dense<0.000000e+00> : vector<8x64xf32>
    %194 = tpu.matmul %193, %191, %cst_135 {dimension_numbers = #tpu.dot_dimension_numbers<[1], [0], [0], [1], [0, 0, 1, 1], [], []>} : vector<8x4xbf16>, vector<4x64xbf16>, vector<8x64xf32> -> vector<8x64xf32>
    %195 = arith.addf %182, %194 : vector<8x64xf32>
    %c0_136 = arith.constant 0 : index
    %c0_137 = arith.constant 0 : index
    %c0_138 = arith.constant 0 : index
    %c0_139 = arith.constant 0 : index
    %c0_140 = arith.constant 0 : index
    %196 = vector.load %arg2[%c0_136, %c0_137, %c0_138, %c0_139, %c0_140] : memref<1x2x2x4x64xbf16, #tpu.memory_space<vmem>>, vector<1x1x1x4x64xbf16>
    %197 = vector.shape_cast %196 : vector<1x1x1x4x64xbf16> to vector<4x64xbf16>
    %198 = vector.extract_strided_slice %197 {offsets = [0, 9], sizes = [4, 55], strides = [1, 1]} : vector<4x64xbf16> to vector<4x55xbf16>
    %199 = vector.extract_strided_slice %197 {offsets = [0, 0], sizes = [4, 9], strides = [1, 1]} : vector<4x64xbf16> to vector<4x9xbf16>
    %200 = tpu.concatenate %198, %199 in 1 : vector<4x55xbf16>, vector<4x9xbf16> -> vector<4x64xbf16>
    %201 = arith.andi %24, %20 : vector<1x64xi1>
    %cst_141 = arith.constant 0.000000e+00 : bf16
    %202 = vector.broadcast %cst_141 : bf16 to vector<4x64xbf16>
    %203 = vector.shape_cast %201 : vector<1x64xi1> to vector<1x64xi1>
    %204 = vector.broadcast %203 : vector<1x64xi1> to vector<4x64xi1>
    %205 = arith.select %204, %200, %202 : vector<4x64xi1>, vector<4x64xbf16>
    %c15 = arith.constant 15 : index
    %c0_142 = arith.constant 0 : index
    %c0_143 = arith.constant 0 : index
    %206 = vector.load %arg3[%c15, %c0_142, %c0_143] : memref<16x8x4xbf16, #tpu.memory_space<vmem>>, vector<1x8x4xbf16>
    %207 = vector.shape_cast %206 : vector<1x8x4xbf16> to vector<8x4xbf16>
    %cst_144 = arith.constant dense<0.000000e+00> : vector<8x64xf32>
    %208 = tpu.matmul %207, %205, %cst_144 {dimension_numbers = #tpu.dot_dimension_numbers<[1], [0], [0], [1], [0, 0, 1, 1], [], []>} : vector<8x4xbf16>, vector<4x64xbf16>, vector<8x64xf32> -> vector<8x64xf32>
    %209 = arith.addf %195, %208 : vector<8x64xf32>
    %cst_145 = arith.constant dense<0.000000e+00> : vector<8xf32>
    %210 = vector.multi_reduction <add>, %209, %cst_145 [1] : vector<8x64xf32> to vector<8xf32>
    %211 = vector.shape_cast %210 : vector<8xf32> to vector<8x1xf32>
    %cst_146 = arith.constant 1.562500e-02 : f32
    %212 = vector.broadcast %cst_146 : f32 to vector<8x1xf32>
    %213 = arith.mulf %211, %212 : vector<8x1xf32>
    %214 = arith.mulf %209, %209 : vector<8x64xf32>
    %cst_147 = arith.constant dense<0.000000e+00> : vector<8xf32>
    %215 = vector.multi_reduction <add>, %214, %cst_147 [1] : vector<8x64xf32> to vector<8xf32>
    %216 = vector.shape_cast %215 : vector<8xf32> to vector<8x1xf32>
    %cst_148 = arith.constant 1.562500e-02 : f32
    %217 = vector.broadcast %cst_148 : f32 to vector<8x1xf32>
    %218 = arith.mulf %216, %217 : vector<8x1xf32>
    %219 = arith.mulf %213, %213 : vector<8x1xf32>
    %220 = arith.subf %218, %219 : vector<8x1xf32>
    %cst_149 = arith.constant 0.000000e+00 : f32
    %221 = vector.broadcast %cst_149 : f32 to vector<8x1xf32>
    %222 = arith.maximumf %220, %221 : vector<8x1xf32>
    %223 = vector.broadcast %213 : vector<8x1xf32> to vector<8x64xf32>
    %224 = arith.subf %209, %223 : vector<8x64xf32>
    %cst_150 = arith.constant 9.99999974E-6 : f32
    %225 = vector.broadcast %cst_150 : f32 to vector<8x1xf32>
    %226 = arith.addf %222, %225 : vector<8x1xf32>
    %227 = math.rsqrt %226 : vector<8x1xf32>
    %228 = vector.broadcast %227 : vector<8x1xf32> to vector<8x64xf32>
    %229 = arith.mulf %224, %228 : vector<8x64xf32>
    %cst_151 = arith.constant 2.000000e-01 : f32
    %230 = vector.broadcast %cst_151 : f32 to vector<8x64xf32>
    %231 = arith.mulf %230, %229 : vector<8x64xf32>
    %232 = arith.maximumf %229, %231 : vector<8x64xf32>
    %233 = arith.truncf %232 : vector<8x64xf32> to vector<8x64xbf16>
    %c0_152 = arith.constant 0 : index
    %c0_153 = arith.constant 0 : index
    %c0_154 = arith.constant 0 : index
    %234 = vector.load %arg4[%c0_152, %c0_153, %c0_154] : memref<1x8x64xbf16, #tpu.memory_space<vmem>>, vector<1x8x64xbf16>
    %235 = vector.shape_cast %234 : vector<1x8x64xbf16> to vector<8x64xbf16>
    %236 = vector.shape_cast %233 : vector<8x64xbf16> to vector<1x8x64xbf16>
    tpu.vector_store %arg4[%c0_152, %c0_153, %c0_154], %236 {strides = array<i32>} : memref<1x8x64xbf16, #tpu.memory_space<vmem>>, vector<1x8x64xbf16>,
    return
  }
  func.func @transform_0(%arg0: i32, %arg1: i32) -> (i32, i32, i32, i32, i32) {
    %c0_i32 = arith.constant 0 : i32
    %c0_i32_0 = arith.constant 0 : i32
    %c0_i32_1 = arith.constant 0 : i32
    %c0_i32_2 = arith.constant 0 : i32
    %c0_i32_3 = arith.constant 0 : i32
    return %arg0, %c0_i32, %c0_i32_0, %c0_i32_1, %c0_i32_2 : i32, i32, i32, i32, i32
  }
  func.func @transform_1(%arg0: i32, %arg1: i32) -> (i32, i32, i32) {
    %c0_i32 = arith.constant 0 : i32
    %c0_i32_0 = arith.constant 0 : i32
    %c0_i32_1 = arith.constant 0 : i32
    return %c0_i32, %arg1, %c0_i32_0 : i32, i32, i32
  }
  func.func @transform_2(%arg0: i32, %arg1: i32) -> (i32, i32, i32) {
    %c0_i32 = arith.constant 0 : i32
    %c0_i32_0 = arith.constant 0 : i32
    return %arg0, %arg1, %c0_i32 : i32, i32, i32
  }
}

</mosaic_0001>

<bundles_post_ra>
// kernel: tpu_custom_call.1
= control target key start
LH: loop header
LB: loop body
LE: loop exit
PB: predicated region body
PF: predicated region fallthrough
CT: control target
= control target key end

     0   :  { %7 = vsyncpa [#allocation3], 0  ;;  %s1992_s0 = inlined_call_operand.vmem [shape: bf16[2,2,2,4,64], index: 0, kind: input, shape index: {}]   ;;  %s1993_s1 = inlined_call_operand.vmem [shape: bf16[16,8,4], index: 1, kind: input, shape index: {}]   ;;  %s1994_s2 = inlined_call_operand.hbm [shape: bf16[2,8,64], index: 2, kind: output, shape index: {}]  }
   0x1   :  { %9 = vsyncpa [#allocation3 + $0x1], 0  ;;  %s1643_s9 = smov 0   ;;  %s1645_s10 = smov 0  }
   0x2   :  { %s1647_s11 = smov 0   ;;  %s1649_s12 = smov 0  }
   0x3   :  { %s1651_s13 = smov 0   ;;  %s1653_s14 = smov 0  }
   0x4 LB: > { %s1278_s15 = sadd.s32 4294967295, %s1606_s14   ;;  %s1279_s16 = sadd.s32 4294967294, %s1606_s14   ;;  %s1606_s14 = sphi %s1653_s14, %s15_s14   ;;  %s1602_s13 = sphi %s1651_s13, %s2015_s13   ;;  %s1598_s12 = sphi %s1649_s12, %s2014_s12   ;;  %s1594_s11 = sphi %s1647_s11, %s2013_s11   ;;  %s1590_s10 = sphi %s1645_s10, %s2012_s10   ;;  %s1586_s9 = sphi %s1643_s9, %s2011_s9  }
   0x5   : > { %s27_s17 = sadd.s32 1, %s1602_s13  ;;  %s88_s18 = sadd.s32 1, %s1594_s11 }
   0x6   : > { %p29_p0 = scmp.ge.s32.totalorder %s27_s17, 2  ;;  %p98_p1 = scmp.ne.s32.totalorder %s1594_s11, %s1590_s10 }
   0x7   : > { %p99_p2 = scmp.eq.s32.totalorder %s1278_s15, 1  ;;  %p104_p3 = scmp.ne.s32.totalorder %s1590_s10, %s1586_s9 }
   0x8   : > { %s2017_s17 = smov (%p29_p0, %s27_s17), 0  ;;  %p105_p5 = scmp.eq.s32.totalorder %s1279_s16, 1 }
   0x9   : > { %p1683_p4 = por %p99_p2, %p98_p1  ;;  %s83_s20 = ssub.s32 %s1602_s13, %s2017_s17 }
   0xa   : > { %p1283_p6 = scmp.ge.s32.totalorder %s1606_s14, 1  ;;  %p86_p7 = scmp.eq.s32.totalorder %s83_s20, 0 }
   0xb   : > { %p1690_p8 = por %p105_p5, %p104_p3  ;;  %p138_p9 = scmp.lt.s32.totalorder %s1606_s14, 3 }
   0xc   : > { %s1696_s22 = scalar_select %p86_p7, %s1594_s11, %s88_s18  }
   0xd   : > { %p139_p10 = pnand %p1283_p6, %p138_p9 }
   0xe   : > { %p164_p11 = scmp.lt.s32.totalorder (!%p139_p10), %s1598_s12, 1  ;;  %s1611_s28 = smov (!%p139_p10), 72  }
   0xf   : > { %142 = sbr.rel (%p139_p10) target bundleno = 591 (0x24f), region = 28  ;;  %s1612_s29 = smov (!%p139_p10), 73  }
  0x10   : > { %s1613_s30 = smov (!%p139_p10), 8   ;;  %s1614_s3 = smov (!%p139_p10), 9  }
  0x11   : > { %s1615_s4 = smov (!%p139_p10), 71   ;;  %s1616_s5 = smov (!%p139_p10), 7  }
  0x12   : > { %s1617_s6 = smov (!%p139_p10), 65   ;;  %s1618_s7 = smov (!%p139_p10), 1  }
  0x13   : > { %s1619_s8 = smov (!%p139_p10), 127   ;;  %s1620_s15 = smov (!%p139_p10), 63  }
  0x14   : > { %v174_v0 = vlaneseq  ;;  %v1608_v1 = vmov 1983009808   ;;  %s165_s23 = scalar_select %p164_p11, %s1598_s12, 1  ;;  %v1609_v4 = vmov 0.0   ;;  %vm1610_vm0 = vmmov 0  }
  0x15   : > { %v196_v2 = vunpack.c.l.s4 %v1608_v1  ;;  %1358 = vmatprep.subr.bf16.mxu0 %v1609_v4  ;;  %1364 = vmatprep.subr.bf16.mxu1 %v1609_v4  ;;  %s1621_s16 = smov 121   ;;  %s1622_s18 = smov 57   ;;  %vm231_vm4 = vcmask 64512   ;;  %vm206_vm5 = vcmask 72704   ;;  %vm246_vm8 = vcmask 1041408  }
  0x16   : > { %v199_v3 = vshrl.u32 %v174_v0, 7  ;;  %s1325_s24 = sshll.u32 %s165_s23, 3  ;;  %1360 = vmatprep.mubr.msk.bf16.mxu0 %vm1610_vm0, %v1609_v4  ;;  %1366 = vmatprep.mubr.msk.bf16.mxu1 %vm1610_vm0, %v1609_v4  ;;  %s1623_s20 = smov 120   ;;  %v1721_v15 = vand.u32 127, %v174_v0  ;;  %v1289_v32 = vld [vmem:[%s1993_s1 + $0x4] sm:$0xf] }
  0x17   : > { %v197_v5 = vunpack.c.0.s8 %v196_v2  ;;  %s168_s27 = scalar_lea.vmem %s1992_s0, %s1325_s24  ;;  %s1624_s23 = smov 56   ;;  %vm242_vm10 = vcmask 31744   ;;  %v216_v33 = vld [vmem:[%s1993_s1] sm:$0xf]  ;;  %vm398_vm12 = vcmask 56320   ;;  %vm471_vm14 = vcmask 7168  }
  0x18   : > { %v1709_v7 = vld [vmem:[%s168_s27 + $0x4] sm:$0x3]  ;;  %v1711_v8 = vld [vmem:[%s168_s27 + $0x6] sm:$0x3]  ;;  %v1715_v11 = vld [vmem:[%s168_s27 + $0x2] sm:$0x3] }
  0x19   : > { %v200_v6 = vsub.s32 %v197_v5, %v199_v3  ;;  %v1718_v13 = vld [vmem:[%s168_s27] sm:$0x3]  ;;  %s1625_s24 = smov 119   ;;  %s1626_s25 = smov 55   ;;  %v180_v16 = vand.u32 7, %v1721_v15  ;;  %vm190_vm1 = vcmp.ge.s32.totalorder %v1721_v15, 8 }
  0x1a   : > { %vm1736_vm6 = vmpackc.low %vm190_vm1, %vm190_vm1  ;;  %v1292_v45 = vld [vmem:[%s1993_s1 + $0x8] sm:$0xf]  ;;  %v1294_v46 = vld [vmem:[%s1993_s1 + $0xc] sm:$0xf]  ;;  %v536_v48 = vsel %vm246_vm8, %v1718_v13, 0  ;;  %v585_v59 = vsel %vm246_vm8, %v1715_v11, 0 }
  0x1b   : > { %v226_v9 = vrot.slane %v1709_v7, %v200_v6  ;;  %v201_v10 = vrot.slane %v1711_v8, %v200_v6  ;;  %v466_v12 = vrot.slane %v1715_v11, %v200_v6  ;;  %v635_v14 = vrot.slane %v1718_v13, %v200_v6  ;;  %v1297_v55 = vld [vmem:[%s1993_s1 + $0x10] sm:$0xf]  ;;  %v1299_v56 = vld [vmem:[%s1993_s1 + $0x14] sm:$0xf]  ;;  %v1301_v1 = vld [vmem:[%s1993_s1 + $0x18] sm:$0xf] }
  0x1c   : > { %vm1725_vm2 = vcmp.ge.s32.totalorder %v180_v16, 1  ;;  %vm1741_vm9 = vcmp.lt.s32.totalorder %v180_v16, 7  ;;  %v1303_v2 = vld [vmem:[%s1993_s1 + $0x1c] sm:$0xf]  ;;  %v1307_v16 = vld [vmem:[%s1993_s1 + $0x24] sm:$0xf] }
  0x1d   : > { %227 = vrot.lane.b32.xlu0 %v226_v9, %s1611_s28  ;;  %202 = vrot.lane.b32.xlu1 %v201_v10, %s1612_s29  ;;  %vm211_vm3 = vmand %vm190_vm1, %vm1725_vm2 }
  0x1e   : > { %vm214_vm7 = vmpackc.low %vm211_vm3, %vm211_vm3 }
  0x1f   : > { %vm1759_vm11 = vmand %vm190_vm1, %vm1741_vm9  ;;  %vm640_vm1 = vcmask 515072  }
  0x20   : > { %vm406_vm13 = vmpackc.low %vm1759_vm11, %vm1759_vm11 }
  0x21   : > { %229 = vrot.lane.b32.xlu0 %v226_v9, %s1613_s30  ;;  %204 = vrot.lane.b32.xlu1 %v201_v10, %s1614_s3  ;;  %vm478_vm15 = vmpackc.low %vm1725_vm2, %vm1725_vm2 }
  0x22   : > { %vm647_vm3 = vmpackc.low %vm1741_vm9, %vm1741_vm9 }
  0x25   : > { %336 = vrot.lane.b32.xlu0 %v201_v10, %s1611_s28  ;;  %338 = vrot.lane.b32.xlu1 %v201_v10, %s1613_s30 }
  0x29   : > { %394 = vrot.lane.b32.xlu0 %v226_v9, %s1615_s4  ;;  %396 = vrot.lane.b32.xlu1 %v226_v9, %s1616_s5  ;;  %s1627_s4 = smov [#allocation2]  }
  0x2a   : > { %s1534_s5 = sshll.u32 %s1627_s4, 4  ;;  %s1535_s5 = int_to_ptr.vmem [resolvable:$false] %s1534_s5 }
  0x2d   : > { %467 = vrot.lane.b32.xlu0 %v466_v12, %s1617_s6  ;;  %469 = vrot.lane.b32.xlu1 %v466_v12, %s1618_s7 }
  0x31   : > { %636 = vrot.lane.b32.xlu0 %v635_v14, %s1619_s8  ;;  %638 = vrot.lane.b32.xlu1 %v635_v14, %s1620_s15 }
  0x35   : > { %698 = vrot.lane.b32.xlu0 %v201_v10, %s1617_s6  ;;  %700 = vrot.lane.b32.xlu1 %v201_v10, %s1618_s7 }
  0x39   : > { %854 = vrot.lane.b32.xlu0 %v226_v9, %s1619_s8  ;;  %856 = vrot.lane.b32.xlu1 %v226_v9, %s1620_s15  ;;  %v762_v9 = vsel %vm246_vm8, %v1709_v7, 0 }
  0x3d   : > { %912 = vrot.lane.b32.xlu0 %v466_v12, %s1621_s16  ;;  %914 = vrot.lane.b32.xlu1 %v466_v12, %s1622_s18 }
  0x41   : > { %975 = vrot.lane.b32.xlu0 %v635_v14, %s1623_s20  ;;  %977 = vrot.lane.b32.xlu1 %v635_v14, %s1624_s23 }
  0x45   : > { %1037 = vrot.lane.b32.xlu0 %v466_v12, %s1623_s20  ;;  %1039 = vrot.lane.b32.xlu1 %v466_v12, %s1624_s23  ;;  %s161_s20 = sand.u32 1, %s1590_s10  }
  0x46   : > { %s1284_s23 = sshll.u32 %s161_s20, 2  ;;  %s1181_s30 = scalar_lea.sflag [#allocation3], %s161_s20 }
  0x49   : > { %1095 = vrot.lane.b32.xlu0 %v635_v14, %s1625_s24  ;;  %1097 = vrot.lane.b32.xlu1 %v635_v14, %s1626_s25  ;;  %v1305_v14 = vld [vmem:[%s1993_s1 + $0x20] sm:$0xf]  ;;  %s1322_s24 = sshll.u32 %s1598_s12, 6  ;;  %s163_s25 = scalar_lea.vmem [#allocation2], %s1284_s23 }
  0x4a   : > { %s1195_s26 = sshll.u32 %s163_s25, 4  ;;  %s1193_s29 = scalar_lea.hbm %s1994_s2, %s1322_s24  ;;  %s1196_s26 = int_to_ptr.vmem [resolvable:$true] %s1195_s26 }
  0x4b   : > { %s1530_s3 = scalar_lea.vmem %s1196_s26, 64  ;;  %s1536_s12 = scalar_lea.vmem %s1535_s5, 128 }
  0x4c   : > { %p1531_p12 = scmp.ne.s32.totalorder %s1196_s26, %s1530_s3  ;;  %p1537_p1 = scmp.lt.s32.totalorder %s1196_s26, %s1535_s5 }
  0x4d   : > { %p1538_p2 = scmp.lt.s32.totalorder %s1536_s12, %s1530_s3 }
  0x4e   : > { %p1532_p13 = pnand %p1531_p12, %p1683_p4 }
  0x4f   : > { %p1539_p3 = por %p1538_p2, %p1537_p1 }
  0x50   : > { %p1533_p0 = pneg %p1532_p13 }
  0x52   : > { %p1540_p5 = pnand %p1539_p3, %p1533_p0 }
  0x8f   : > { %v228_v18 = vpop.permute.xlu0 %227  ;;  %v203_v19 = vpop.permute.xlu1 %202 }
  0x93   : > { %v230_v21 = vpop.permute.xlu0 %229  ;;  %v205_v22 = vpop.permute.xlu1 %204 }
  0x94   : > { %v234_v23 = vsel %vm231_vm4, %v228_v18, %v230_v21  ;;  %v209_v24 = vsel %vm206_vm5, %v203_v19, %v205_v22  ;;  %v811_v18 = vsel %vm246_vm8, %v1711_v8, 0 }
  0x95   : > { %v239_v26 = vsel %vm1736_vm6, %v234_v23, 0  ;;  %v215_v27 = vsel %vm214_vm7, %v209_v24, 0  ;;  %vm979_vm7 = vcmask 457728  }
  0x96   : > { %v248_v28 = vsel %vm246_vm8, %v239_v26, 0  ;;  %v294_v29 = vsel %vm246_vm8, %v215_v27, 0  ;;  %v1309_v26 = vld [vmem:[%s1993_s1 + $0x28] sm:$0xf]  ;;  %v1311_v27 = vld [vmem:[%s1993_s1 + $0x2c] sm:$0xf] }
  0x97   : > { %1359 = vmatpush3.bf16.msra.mxu0 %v248_v28  ;;  %v337_v30 = vpop.permute.xlu0 %336  ;;  %1365 = vmatpush3.bf16.msra.mxu1 %v294_v29  ;;  %v339_v31 = vpop.permute.xlu1 %338 }
  0x98   : > { %v342_v35 = vsel %vm231_vm4, %v337_v30, %v339_v31  ;;  %1370 = vmatprep.subr.bf16.mxu0 %v1609_v4  ;;  %1376 = vmatprep.subr.bf16.mxu1 %v1609_v4  ;;  %vm191_vm4 = vcmp.lt.s32.totalorder %v1721_v15, 56 }
  0x99   : > { %v344_v36 = vsel %vm1736_vm6, %v342_v35, 0  ;;  %vm1867_vm5 = vmand %vm191_vm4, %vm1725_vm2  ;;  %vm916_vm6 = vcmask 465920   ;;  %v1313_v35 = vld [vmem:[%s1993_s1 + $0x30] sm:$0xf] }
  0x9a   : > { %1361 = vmatmul.mubr.msk.bf16.vlgmr.msra.gmra.mxu0 %vm242_vm10, %v1289_v32  ;;  %1367 = vmatmul.mubr.msk.bf16.vlgmr.msra.gmra.mxu1 %vm242_vm10, %v216_v33  ;;  %v351_v37 = vsel %vm246_vm8, %v344_v36, 0  ;;  %vm924_vm2 = vmpackc.low %vm1867_vm5, %vm1867_vm5  ;;  %v1315_v36 = vld [vmem:[%s1993_s1 + $0x34] sm:$0xf] }
  0x9b   : > { %v395_v38 = vpop.permute.xlu0 %394  ;;  %1371 = vmatpush3.bf16.msra.mxu0 %v351_v37  ;;  %v397_v39 = vpop.permute.xlu1 %396  ;;  %1372 = vmatprep.mubr.msk.bf16.mxu0 %vm1610_vm0, %v1609_v4  ;;  %vm1888_vm11 = vmpackc.low %vm191_vm4, %vm191_vm4 }
  0x9c   : > { %v401_v40 = vsel %vm398_vm12, %v395_v38, %v397_v39  ;;  %1378 = vmatprep.mubr.msk.bf16.mxu1 %vm1610_vm0, %v1609_v4  ;;  %1382 = vmatprep.subr.bf16.mxu0 %v1609_v4  ;;  %vm1099_vm12 = vcmask 449536   ;;  %v1317_v39 = vld [vmem:[%s1993_s1 + $0x38] sm:$0xf] }
  0x9d   : > { %v407_v41 = vsel %vm406_vm13, %v401_v40, 0  ;;  %vm1911_vm13 = vmand %vm191_vm4, %vm1741_vm9  ;;  %v1319_v40 = vld [vmem:[%s1993_s1 + $0x3c] sm:$0xf] }
  0x9e   : > { %v414_v42 = vsel %vm246_vm8, %v407_v41, 0 }
  0x9f   : > { %1377 = vmatpush3.bf16.msra.mxu1 %v414_v42  ;;  %v468_v43 = vpop.permute.xlu0 %467  ;;  %v470_v44 = vpop.permute.xlu1 %469 }
  0xa0   : > { %v474_v47 = vsel %vm471_vm14, %v468_v43, %v470_v44  ;;  %1388 = vmatprep.subr.bf16.mxu1 %v1609_v4 }
  0xa1   : > { %v479_v49 = vsel %vm478_vm15, %v474_v47, 0 }
  0xa2   : > { %1373 = vmatmul.mubr.msk.bf16.vlgmr.msra.gmra.mxu0 %vm242_vm10, %v1292_v45  ;;  %1379 = vmatmul.mubr.msk.bf16.vlgmr.msra.gmra.mxu1 %vm242_vm10, %v1294_v46  ;;  %v486_v50 = vsel %vm246_vm8, %v479_v49, 0 }
  0xa3   : > { %1383 = vmatpush3.bf16.msra.mxu0 %v486_v50  ;;  %1389 = vmatpush3.bf16.msra.mxu1 %v536_v48  ;;  %v637_v51 = vpop.permute.xlu0 %636  ;;  %v639_v52 = vpop.permute.xlu1 %638 }
  0xa4   : > { %1384 = vmatprep.mubr.msk.bf16.mxu0 %vm1610_vm0, %v1609_v4  ;;  %1390 = vmatprep.mubr.msk.bf16.mxu1 %vm1610_vm0, %v1609_v4  ;;  %v643_v53 = vsel %vm640_vm1, %v637_v51, %v639_v52 }
  0xa5   : > { %v648_v54 = vsel %vm647_vm3, %v643_v53, 0  ;;  %1394 = vmatprep.subr.bf16.mxu0 %v1609_v4  ;;  %1400 = vmatprep.subr.bf16.mxu1 %v1609_v4 }
  0xa6   : > { %v655_v60 = vsel %vm246_vm8, %v648_v54, 0 }
  0xa7   : > { %v699_v57 = vpop.permute.xlu0 %698  ;;  %v701_v58 = vpop.permute.xlu1 %700 }
  0xa8   : > { %v704_v61 = vsel %vm471_vm14, %v699_v57, %v701_v58  ;;  %vm1107_vm14 = vmpackc.low %vm1911_vm13, %vm1911_vm13 }
  0xa9   : > { %v706_v0 = vsel %vm478_vm15, %v704_v61, 0 }
  0xaa   : > { %1385 = vmatmul.mubr.msk.bf16.vlgmr.msra.gmra.mxu0 %vm242_vm10, %v1297_v55  ;;  %1391 = vmatmul.mubr.msk.bf16.vlgmr.msra.gmra.mxu1 %vm242_vm10, %v1299_v56  ;;  %v713_v6 = vsel %vm246_vm8, %v706_v0, 0 }
  0xab   : > { %1395 = vmatpush3.bf16.msra.mxu0 %v585_v59  ;;  %1401 = vmatpush3.bf16.msra.mxu1 %v655_v60  ;;  %v855_v62 = vpop.permute.xlu0 %854  ;;  %v857_v63 = vpop.permute.xlu1 %856 }
  0xac   : > { %1396 = vmatprep.mubr.msk.bf16.mxu0 %vm1610_vm0, %v1609_v4  ;;  %1402 = vmatprep.mubr.msk.bf16.mxu1 %vm1610_vm0, %v1609_v4  ;;  %v860_v10 = vsel %vm640_vm1, %v855_v62, %v857_v63 }
  0xad   : > { %1406 = vmatprep.subr.bf16.mxu0 %v1609_v4  ;;  %1412 = vmatprep.subr.bf16.mxu1 %v1609_v4  ;;  %v862_v7 = vsel %vm647_vm3, %v860_v10, 0 }
  0xae   : > { %v869_v17 = vsel %vm246_vm8, %v862_v7, 0 }
  0xaf   : > { %v913_v3 = vpop.permute.xlu0 %912  ;;  %v915_v5 = vpop.permute.xlu1 %914 }
  0xb0   : > { %v919_v21 = vsel %vm916_vm6, %v913_v3, %v915_v5 }
  0xb1   : > { %v925_v23 = vsel %vm924_vm2, %v919_v21, 0 }
  0xb2   : > { %1397 = vmatmul.mubr.msk.bf16.vlgmr.msra.gmra.mxu0 %vm242_vm10, %v1301_v1  ;;  %1403 = vmatmul.mubr.msk.bf16.vlgmr.msra.gmra.mxu1 %vm242_vm10, %v1303_v2  ;;  %v932_v31 = vsel %vm246_vm8, %v925_v23, 0 }
  0xb3   : > { %1407 = vmatpush3.bf16.msra.mxu0 %v713_v6  ;;  %1413 = vmatpush3.bf16.msra.mxu1 %v762_v9  ;;  %v976_v11 = vpop.permute.xlu0 %975  ;;  %v978_v12 = vpop.permute.xlu1 %977 }
  0xb4   : > { %1408 = vmatprep.mubr.msk.bf16.mxu0 %vm1610_vm0, %v1609_v4  ;;  %1414 = vmatprep.mubr.msk.bf16.mxu1 %vm1610_vm0, %v1609_v4  ;;  %v982_v8 = vsel %vm979_vm7, %v976_v11, %v978_v12 }
  0xb5   : > { %1418 = vmatprep.subr.bf16.mxu0 %v1609_v4  ;;  %1424 = vmatprep.subr.bf16.mxu1 %v1609_v4  ;;  %v987_v24 = vsel %vm1888_vm11, %v982_v8, 0 }
  0xb6   : > { %v994_v32 = vsel %vm246_vm8, %v987_v24, 0 }
  0xb7   : > { %v1038_v19 = vpop.permute.xlu0 %1037  ;;  %v1040_v20 = vpop.permute.xlu1 %1039 }
  0xb8   : > { %v1043_v33 = vsel %vm979_vm7, %v1038_v19, %v1040_v20 }
  0xb9   : > { %v1045_v25 = vsel %vm1888_vm11, %v1043_v33, 0 }
  0xba   : > { %1409 = vmatmul.mubr.msk.bf16.vlgmr.msra.gmra.mxu0 %vm242_vm10, %v1305_v14  ;;  %1415 = vmatmul.mubr.msk.bf16.vlgmr.msra.gmra.mxu1 %vm242_vm10, %v1307_v16  ;;  %v1052_v37 = vsel %vm246_vm8, %v1045_v25, 0 }
  0xbb   : > { %1419 = vmatpush3.bf16.msra.mxu0 %v811_v18  ;;  %1425 = vmatpush3.bf16.msra.mxu1 %v869_v17  ;;  %v1096_v28 = vpop.permute.xlu0 %1095  ;;  %v1098_v30 = vpop.permute.xlu1 %1097 }
  0xbc   : > { %1420 = vmatprep.mubr.msk.bf16.mxu0 %vm1610_vm0, %v1609_v4  ;;  %1426 = vmatprep.mubr.msk.bf16.mxu1 %vm1610_vm0, %v1609_v4  ;;  %v1102_v15 = vsel %vm1099_vm12, %v1096_v28, %v1098_v30 }
  0xbd   : > { %1430 = vmatprep.subr.bf16.mxu0 %v1609_v4  ;;  %1436 = vmatprep.subr.bf16.mxu1 %v1609_v4  ;;  %v1108_v34 = vsel %vm1107_vm14, %v1102_v15, 0 }
  0xbe   : > { %v1115_v38 = vsel %vm246_vm8, %v1108_v34, 0  ;;  %vm1178_vm8 = vcmask 519168  }
  0xc2   : > { %1421 = vmatmul.mubr.msk.bf16.vlgmr.msra.gmra.mxu0 %vm242_vm10, %v1309_v26  ;;  %1427 = vmatmul.mubr.msk.bf16.vlgmr.msra.gmra.mxu1 %vm242_vm10, %v1311_v27 }
  0xc3   : > { %1431 = vmatpush3.bf16.msra.mxu0 %v932_v31  ;;  %1437 = vmatpush3.bf16.msra.mxu1 %v994_v32 }
  0xc4   : > { %1432 = vmatprep.mubr.msk.bf16.mxu0 %vm1610_vm0, %v1609_v4  ;;  %1438 = vmatprep.mubr.msk.bf16.mxu1 %vm1610_vm0, %v1609_v4 }
  0xc5   : > { %1442 = vmatprep.subr.bf16.mxu0 %v1609_v4  ;;  %1448 = vmatprep.subr.bf16.mxu1 %v1609_v4 }
  0xca   : > { %1433 = vmatmul.mubr.msk.bf16.vlgmr.msra.gmra.mxu0 %vm242_vm10, %v1313_v35  ;;  %1439 = vmatmul.mubr.msk.bf16.vlgmr.msra.gmra.mxu1 %vm242_vm10, %v1315_v36 }
  0xcb   : > { %1443 = vmatpush3.bf16.msra.mxu0 %v1052_v37  ;;  %1449 = vmatpush3.bf16.msra.mxu1 %v1115_v38 }
  0xcc   : > { %1444 = vmatprep.mubr.msk.bf16.mxu0 %vm1610_vm0, %v1609_v4  ;;  %1450 = vmatprep.mubr.msk.bf16.mxu1 %vm1610_vm0, %v1609_v4  ;;  %vm1158_vm0 = vcmask 523264  }
  0xd2   : > { %1445 = vmatmul.mubr.msk.bf16.vlgmr.msra.gmra.mxu0 %vm242_vm10, %v1317_v39  ;;  %1451 = vmatmul.mubr.msk.bf16.vlgmr.msra.gmra.mxu1 %vm242_vm10, %v1319_v40 }
 0x15a   : > { %v284_v41 = vpop.f32.mrf.mxu0  ;;  %v330_v42 = vpop.f32.mrf.mxu1 }
 0x15b   : > { %v331_v60 = vadd.f32 %v330_v42, %v284_v41 }
 0x15c   : > { %v1362_v43 = vpop.f32.mrf.mxu0  ;;  %v1368_v44 = vpop.f32.mrf.mxu1 }
 0x15e   : > { %v287_v45 = vpop.f32.mrf.mxu0  ;;  %v333_v46 = vpop.f32.mrf.mxu1 }
 0x160   : > { %v1363_v47 = vpop.f32.mrf.mxu0  ;;  %v1369_v4 = vpop.f32.mrf.mxu1 }
 0x162   : > { %v387_v48 = vpop.f32.mrf.mxu0  ;;  %v450_v49 = vpop.f32.mrf.mxu1 }
 0x163   : > { %v393_v63 = vadd.f32 %v387_v48, %v331_v60 }
 0x164   : > { %v1374_v50 = vpop.f32.mrf.mxu0  ;;  %v1380_v51 = vpop.f32.mrf.mxu1 }
 0x165   : > { %v456_v5 = vadd.f32 %v450_v49, %v393_v63 }
 0x166   : > { %v390_v52 = vpop.f32.mrf.mxu0  ;;  %v453_v53 = vpop.f32.mrf.mxu1 }
 0x168   : > { %v1375_v54 = vpop.f32.mrf.mxu0  ;;  %v1381_v55 = vpop.f32.mrf.mxu1 }
 0x16a   : > { %v522_v56 = vpop.f32.mrf.mxu0  ;;  %v572_v57 = vpop.f32.mrf.mxu1 }
 0x16b   : > { %v528_v10 = vadd.f32 %v522_v56, %v456_v5 }
 0x16c   : > { %v1386_v58 = vpop.f32.mrf.mxu0  ;;  %v1392_v59 = vpop.f32.mrf.mxu1 }
 0x16d   : > { %v578_v14 = vadd.f32 %v572_v57, %v528_v10 }
 0x16e   : > { %v525_v61 = vpop.f32.mrf.mxu0  ;;  %v575_v62 = vpop.f32.mrf.mxu1 }
 0x170   : > { %v1387_v0 = vpop.f32.mrf.mxu0  ;;  %v1393_v1 = vpop.f32.mrf.mxu1 }
 0x172   : > { %v621_v2 = vpop.f32.mrf.mxu0  ;;  %v691_v3 = vpop.f32.mrf.mxu1 }
 0x173   : > { %v627_v17 = vadd.f32 %v621_v2, %v578_v14 }
 0x174   : > { %v1398_v6 = vpop.f32.mrf.mxu0  ;;  %v1404_v9 = vpop.f32.mrf.mxu1 }
 0x175   : > { %v697_v8 = vadd.f32 %v691_v3, %v627_v17 }
 0x176   : > { %v624_v11 = vpop.f32.mrf.mxu0  ;;  %v694_v12 = vpop.f32.mrf.mxu1 }
 0x178   : > { %v1399_v7 = vpop.f32.mrf.mxu0  ;;  %v1405_v13 = vpop.f32.mrf.mxu1 }
 0x17a   : > { %v749_v16 = vpop.f32.mrf.mxu0  ;;  %v798_v18 = vpop.f32.mrf.mxu1 }
 0x17b   : > { %v755_v26 = vadd.f32 %v749_v16, %v697_v8 }
 0x17c   : > { %v1410_v19 = vpop.f32.mrf.mxu0  ;;  %v1416_v20 = vpop.f32.mrf.mxu1 }
 0x17d   : > { %v804_v31 = vadd.f32 %v798_v18, %v755_v26 }
 0x17e   : > { %v752_v21 = vpop.f32.mrf.mxu0  ;;  %v801_v22 = vpop.f32.mrf.mxu1 }
 0x180   : > { %v1411_v23 = vpop.f32.mrf.mxu0  ;;  %v1417_v24 = vpop.f32.mrf.mxu1 }
 0x182   : > { %v847_v27 = vpop.f32.mrf.mxu0  ;;  %v905_v28 = vpop.f32.mrf.mxu1 }
 0x183   : > { %v853_v15 = vadd.f32 %v847_v27, %v804_v31 }
 0x184   : > { %v1422_v29 = vpop.f32.mrf.mxu0  ;;  %v1428_v30 = vpop.f32.mrf.mxu1 }
 0x185   : > { %v911_v37 = vadd.f32 %v905_v28, %v853_v15 }
 0x186   : > { %v850_v32 = vpop.f32.mrf.mxu0  ;;  %v908_v33 = vpop.f32.mrf.mxu1 }
 0x188   : > { %v1423_v25 = vpop.f32.mrf.mxu0  ;;  %v1429_v34 = vpop.f32.mrf.mxu1 }
 0x18a   : > { %v968_v35 = vpop.f32.mrf.mxu0  ;;  %v1030_v36 = vpop.f32.mrf.mxu1 }
 0x18b   : > { %v974_v40 = vadd.f32 %v968_v35, %v911_v37 }
 0x18c   : > { %v1434_v38 = vpop.f32.mrf.mxu0  ;;  %v1440_v39 = vpop.f32.mrf.mxu1 }
 0x18d   : > { %v1036_v45 = vadd.f32 %v1030_v36, %v974_v40 }
 0x18e   : > { %v971_v41 = vpop.f32.mrf.mxu0  ;;  %v1033_v42 = vpop.f32.mrf.mxu1 }
 0x190   : > { %v1435_v43 = vpop.f32.mrf.mxu0  ;;  %v1441_v44 = vpop.f32.mrf.mxu1 }
 0x192   : > { %v1088_v46 = vpop.f32.mrf.mxu0  ;;  %v1151_v47 = vpop.f32.mrf.mxu1 }
 0x193   : > { %v1094_v4 = vadd.f32 %v1088_v46, %v1036_v45 }
 0x194   : > { %v1446_v48 = vpop.f32.mrf.mxu0  ;;  %v1452_v49 = vpop.f32.mrf.mxu1 }
 0x195   : > { %v1157_v50 = vadd.f32 %v1151_v47, %v1094_v4 }
 0x196   : > { %v1091_v51 = vpop.f32.mrf.mxu0  ;;  %v1154_v52 = vpop.f32.mrf.mxu1 }
 0x197   : > { %v1159_v53 = vsel %vm1158_vm0, %v1157_v50, 0.0  ;;  %v1163_v54 = vmul.f32 %v1157_v50, %v1157_v50 }
 0x198   : > { %v1447_v55 = vpop.f32.mrf.mxu0  ;;  %1160 = vadd.xlane.f32.xlu0 %v1159_v53  ;;  %v1453_v56 = vpop.f32.mrf.mxu1 }
 0x199   : > { %v1164_v57 = vsel %vm1158_vm0, %v1163_v54, 0.0 }
 0x19a   : > { %1165 = vadd.xlane.f32.xlu1 %v1164_v57 }
 0x221   : > { %v1161_v58 = vpop.xlane.xlu0 %1160 }
 0x222   : > { %v1162_v59 = vmul.f32 0.015625, %v1161_v58 }
 0x223   : > { %v1166_v60 = vpop.xlane.xlu1 %1165 }
 0x224   : > { %v1168_v61 = vmul.f32 %v1162_v59, %v1162_v59  ;;  %v1167_v62 = vmul.f32 0.015625, %v1166_v60  ;;  %v1171_v2 = vsub.f32 %v1157_v50, %v1162_v59 }
 0x226   : > { %v1169_v63 = vsub.f32 %v1167_v62, %v1168_v61 }
 0x228   : > { %v1170_v0 = vmax.f32 %v1169_v63, 0.0 }
 0x22a   : > { %v1172_v1 = vadd.f32 1e-05, %v1170_v0 }
 0x22c   : > { %1528 = vrsqrt.f32 %v1172_v1 }
 0x239   : > { %v1529_v3 = vpop.eup %1528 }
 0x23a   : > { %v1174_v5 = vmul.f32 %v1529_v3, %v1171_v2 }
 0x23c   : > { %v1175_v6 = vmul.f32 0.2, %v1174_v5 }
 0x23e   : > { %v1176_v9 = vmax.f32 %v1174_v5, %v1175_v6 }
 0x240   : > { %v1177_v10 = vpack.c.bf16 %v1176_v9, %v1176_v9 }
 0x242   : > { %1179 = vst.msk [vmem:[%s163_s25] sm:$0xf] %vm1178_vm8, %v1177_v10 }
 0x243   : > { %1543 = shalt.err (!%p1540_p5)
}
 0x244   : > { %s1544_s6 = scalar_lea.hbm %s1193_s29, 64  ;;  %s1548_s15 = scalar_lea.hbm %s1994_s2, 128 }
 0x245   : > { %p1545_p6 = scmp.ne.s32.totalorder %s1193_s29, %s1544_s6  ;;  %p1549_p10 = scmp.lt.s32.totalorder %s1193_s29, %s1994_s2 }
 0x246   : > { %p1550_p11 = scmp.lt.s32.totalorder %s1548_s15, %s1544_s6 }
 0x247   : > { %p1546_p7 = pnand %p1545_p6, %p1683_p4 }
 0x248   : > { %p1551_p12 = por %p1550_p11, %p1549_p10 }
 0x249   : > { %p1547_p9 = pneg %p1546_p7 }
 0x24b   : > { %p1552_p13 = pnand %p1551_p12, %p1547_p9 }
 0x24d   : > { %1555 = shalt.err (!%p1552_p13)
}
 0x24e   : > { %1454 = dma.vmem_to_hbm [thread:$0]  (%p1683_p4), %s1196_s26, 64, %s1193_s29, %s1181_s30  }
 0x24f PF: > { %p1460_p0 = scmp.ge.s32.totalorder %s1606_s14, 2  ;;  %s1207_s20 = sand.u32 1, %s1586_s9  }
 0x250   : > { %s1208_s23 = scalar_lea.sflag [#allocation3], %s1207_s20 }
 0x251   : > { %p1457_p1 = pnand %p1460_p0, %p1690_p8 }
 0x253   : > { %p1458_p2 = pneg %p1457_p1 }
 0x255   : > { %1581 = dma.done.wait (%p1458_p2), %s1208_s23, 64  }
 0x256   : > { %1583 = vsyncadd (%p1458_p2), %s1208_s23, 4294967232  ;;  %s15_s14 = sadd.s32 1, %s1606_s14   ;;  %s2011_s9 = smov %s1590_s10 }
 0x257   : > { %p12_p3 = scmp.ge.s32.totalorder %s15_s14, 4   ;;  %s2012_s10 = smov %s1594_s11 }
 0x258   : > { %s2013_s11 = smov %s1696_s22  ;;  %s2014_s12 = smov %s1602_s13 }
 0x259   : > { %s2015_s13 = smov %s2017_s17  ;;  %14 = sbr.rel (!%p12_p3) target bundleno = 4 (0x4), region = 84 }
 0x25e   :  { %1213 = vsyncpa [#allocation3], 1 }
 0x25f   :  { %1215 = vsyncpa [#allocation3 + $0x1], 1 }

</bundles_post_ra>
